<compile_context>
chip_gen: v5e
topology: v5e:2x2
jax: 0.10.0
libtpu: 0.0.40
codegen_flags: <defaults>
</compile_context>

<pallas_src>
import math

import jax
import jax.numpy as jnp
from jax.experimental import pallas as pl
from jax.experimental.pallas import tpu as pltpu


def _round_up(a, m):
    return (a + m - 1) // m * m


def _relu6(x):
    return jnp.clip(x, 0.0, 6.0)


def _choose_batch_tile(B, block_b):
    # The lane-dense (1, TB) reward block requires TB % 128 == 0 unless TB
    # covers the whole batch.  Large tiles amortize per-grid-step overhead;
    # capping at ceil(B/2) keeps >= 2 grid steps so both TensorCores get work
    # on v7x (no-op on single-core v5e/v6e).
    if B <= 256:
        return B
    cap = max(128, (block_b // 128) * 128)
    return min(cap, _round_up(pl.cdiv(B, 2), 128))


def _rnn_reward_kernel(x_ref, h0_ref, w1t_ref, b1_ref, wiht_ref, whht_ref,
                       brnn_ref, w2p_ref, b2_ref, rew_ref, hid_ref):
    # x_ref:   (TB, n_in)   h0_ref: (TB, H)
    # w1t_ref: (n_in, F1)   b1_ref: (1, F1)
    # wiht_ref:(F1, H)      whht_ref:(H, H)   brnn_ref:(1, H)  (= b_ih + b_hh)
    # w2p_ref: (8, H)  row 0 = fc2 weight, rows 1..7 zero
    # b2_ref:  (1, 1) scalar in SMEM
    # rew_ref: (1, TB) lane-dense reward row     hid_ref: (TB, H)

    # fc1 + ReLU6 (MXU, f32 accumulation)
    z1 = jnp.dot(x_ref[...], w1t_ref[...], preferred_element_type=jnp.float32)
    z1 = _relu6(z1 + b1_ref[...])

    # single-step tanh RNN cell: h' = tanh(z1 @ Wih^T + h0 @ Whh^T + (b_ih + b_hh))
    pre = (jnp.dot(z1, wiht_ref[...], preferred_element_type=jnp.float32)
           + jnp.dot(h0_ref[...], whht_ref[...], preferred_element_type=jnp.float32)
           + brnn_ref[...])
    h_new = jnp.tanh(pre)
    hid_ref[...] = h_new.astype(hid_ref.dtype)

    # fc2 (out_features = 1), produced lane-dense:
    #   (8, H) @ (H, TB) -> (8, TB); row 0 is the real reward row.
    # The (TB,H)->(H,TB) transpose rides the XLU slot instead of issuing TB/8
    # masked single-lane stores on the (contended) vector-store slot.
    r = _relu6(h_new)
    y = jnp.dot(w2p_ref[...], r.T, preferred_element_type=jnp.float32)
    rew_ref[...] = (y[0:1, :] + b2_ref[0, 0]).astype(rew_ref.dtype)


def rnn_reward_forward(x, h, params, *, block_b=8192):
    """Pallas equivalent of TorchRNNReward.forward for 2-D x.

    Args:
      x:      (B, n_input) float32 batch of states.
      h:      (1, B, H) or (B, H) float32 initial hidden state.
      params: dict with PyTorch-layout parameters:
        w1 (F1, n_input), b1 (F1,), w_ih (H, F1), w_hh (H, H),
        b_ih (H,), b_hh (H,), w2 (1, H), b2 (1,)  where F1 = n_h1 // 2, H = n_h1.
    Returns:
      rewards (B, 1) float32, hid (1, B, H) float32.
    """
    x = jnp.asarray(x, jnp.float32)
    B, n_in = x.shape
    h = jnp.asarray(h, jnp.float32)
    h0 = h[0] if h.ndim == 3 else h
    H = h0.shape[-1]
    F1 = params["w1"].shape[0]

    # Pre-transpose weights once on the XLA side so the kernel does plain
    # (TB, K) @ (K, N) matmuls with no in-kernel relayout.
    w1t = jnp.asarray(params["w1"], jnp.float32).T             # (n_in, F1)
    wiht = jnp.asarray(params["w_ih"], jnp.float32).T          # (F1, H)
    whht = jnp.asarray(params["w_hh"], jnp.float32).T          # (H, H)
    b1 = jnp.asarray(params["b1"], jnp.float32).reshape(1, F1)
    brnn = (jnp.asarray(params["b_ih"], jnp.float32)
            + jnp.asarray(params["b_hh"], jnp.float32)).reshape(1, H)
    w2row = jnp.asarray(params["w2"], jnp.float32).reshape(1, H)
    # Sublane-pad the 1-row fc2 weight to 8 rows (rows 1..7 zero) so the MXU
    # matmul in the kernel never sees an M=1 left operand.
    w2p = jnp.concatenate([w2row, jnp.zeros((7, H), jnp.float32)], axis=0)
    b2 = jnp.asarray(params["b2"], jnp.float32).reshape(1, 1)

    # Batch tiling: no padding; the last (possibly partial) block is masked by
    # Pallas, so x/h0/hid/reward are each streamed through HBM exactly once.
    TB = _choose_batch_tile(B, block_b)
    n_tiles = pl.cdiv(B, TB)

    weight_bytes = 4 * (n_in * F1 + F1 * H + H * H + F1 + H + 8 * H + 1)
    cost = pl.CostEstimate(
        flops=2 * B * (n_in * F1 + F1 * H + H * H + H),
        transcendentals=B * H,
        bytes_accessed=4 * B * (n_in + 2 * H + 1) + weight_bytes,
    )

    rew_row, hid = pl.pallas_call(
        _rnn_reward_kernel,
        out_shape=(jax.ShapeDtypeStruct((1, B), jnp.float32),
                   jax.ShapeDtypeStruct((B, H), jnp.float32)),
        grid_spec=pltpu.PrefetchScalarGridSpec(
            num_scalar_prefetch=0,
            grid=(n_tiles,),
            in_specs=[
                pl.BlockSpec((TB, n_in), lambda i: (i, 0)),     # x tile (streamed)
                pl.BlockSpec((TB, H), lambda i: (i, 0)),        # h0 tile (streamed)
                pl.BlockSpec((n_in, F1), lambda i: (0, 0)),     # W1^T   (resident)
                pl.BlockSpec((1, F1), lambda i: (0, 0)),        # b1     (resident)
                pl.BlockSpec((F1, H), lambda i: (0, 0)),        # Wih^T  (resident)
                pl.BlockSpec((H, H), lambda i: (0, 0)),         # Whh^T  (resident)
                pl.BlockSpec((1, H), lambda i: (0, 0)),         # b_ih + b_hh
                pl.BlockSpec((8, H), lambda i: (0, 0)),         # fc2 weight (padded)
                pl.BlockSpec(memory_space=pltpu.MemorySpace.SMEM),  # fc2 bias scalar
            ],
            out_specs=[
                pl.BlockSpec((1, TB), lambda i: (0, i)),        # lane-dense rewards
                pl.BlockSpec((TB, H), lambda i: (i, 0)),        # new hidden state
            ],
        ),
        compiler_params=pltpu.CompilerParams(
            dimension_semantics=("parallel",),
        ),
        cost_estimate=cost,
    )(x, h0, w1t, b1, wiht, whht, brnn, w2p, b2)

    rewards = rew_row.reshape(B, 1)   # (1,B) -> (B,1): same contiguous layout, free
    # TODO(synk): the 1-D single-state path of forward() (x.ndim == 1) squeezes the
    # outputs differently; this wrapper implements the batched path get_rewards() uses.
    return rewards, hid[None]         # hid shaped (num_layers=1, B, H) like nn.RNN


def reference_forward(x, h0, params):
    """Plain-JAX reference of TorchRNNReward.forward (seq_len = 1)."""
    z1 = jnp.clip(x @ params["w1"].T + params["b1"], 0.0, 6.0)
    h_new = jnp.tanh(z1 @ params["w_ih"].T + params["b_ih"]
                     + h0 @ params["w_hh"].T + params["b_hh"])
    r = jnp.clip(h_new, 0.0, 6.0)
    y = r @ params["w2"].T + params["b2"]
    return y, h_new


if __name__ == "__main__":
    # Small shapes consistent with the module: batch=8 states, n_input=32,
    # n_h1=64 (so fc1 out = 32, hidden = 64), n_h2=1.
    n_input, n_h1, n_h2 = 32, 64, 1
    n_fc1 = n_h1 // 2
    B = 8

    key = jax.random.PRNGKey(0)
    keys = jax.random.split(key, 10)

    def u(k, shape, fan_in):
        bound = 1.0 / math.sqrt(fan_in)
        return jax.random.uniform(k, shape, jnp.float32, minval=-bound, maxval=bound)

    params = dict(
        w1=u(keys[0], (n_fc1, n_input), n_input),
        b1=u(keys[1], (n_fc1,), n_input),
        w_ih=u(keys[2], (n_h1, n_fc1), n_h1),
        w_hh=u(keys[3], (n_h1, n_h1), n_h1),
        b_ih=u(keys[4], (n_h1,), n_h1),
        b_hh=u(keys[5], (n_h1,), n_h1),
        w2=u(keys[6], (n_h2, n_h1), n_h1),
        b2=u(keys[7], (n_h2,), n_h1),
    )

    x = jax.random.normal(keys[8], (B, n_input), jnp.float32)
    h = 0.1 * jax.random.normal(keys[9], (1, B, n_h1), jnp.float32)

    rewards, hid = rnn_reward_forward(x, h, params)
    rewards = jax.block_until_ready(rewards)
    hid = jax.block_until_ready(hid)

    ref_rewards, ref_hid = reference_forward(x, h[0], params)

    assert rewards.shape == (B, n_h2), rewards.shape
    assert hid.shape == (1, B, n_h1), hid.shape
    assert jnp.allclose(rewards, ref_rewards, atol=1e-4, rtol=1e-4), (rewards, ref_rewards)
    assert jnp.allclose(hid[0], ref_hid, atol=1e-4, rtol=1e-4)

    print("KERNEL_OK")
</pallas_src>

<mosaic_0001>
module attributes {stable_mosaic.version = 11 : i64} {
  func.func @_rnn_reward_kernel(%arg0: i32, %arg1: memref<8x32xf32, #tpu.memory_space<vmem>>, %arg2: memref<8x64xf32, #tpu.memory_space<vmem>>, %arg3: memref<32x32xf32, #tpu.memory_space<vmem>>, %arg4: memref<1x32xf32, #tpu.memory_space<vmem>>, %arg5: memref<32x64xf32, #tpu.memory_space<vmem>>, %arg6: memref<64x64xf32, #tpu.memory_space<vmem>>, %arg7: memref<1x64xf32, #tpu.memory_space<vmem>>, %arg8: memref<8x64xf32, #tpu.memory_space<vmem>>, %arg9: memref<1x1xf32, #tpu.memory_space<smem>>, %arg10: memref<1x8xf32, #tpu.memory_space<vmem>>, %arg11: memref<8x64xf32, #tpu.memory_space<vmem>>) attributes {dimension_semantics = [#tpu.dimension_semantics<parallel>], iteration_bounds = array<i64: 1>, scalar_prefetch = 0 : i64, scratch_operands = 0 : i64, tpu.core_type = #tpu.core_type<tc>, window_params = [{transform_indices = @transform_0, window_bounds = array<i64: 8, 32>}, {transform_indices = @transform_1, window_bounds = array<i64: 8, 64>}, {pipeline_mode = #tpu.pipeline_mode<synchronous>, transform_indices = @transform_2, window_bounds = array<i64: 32, 32>}, {pipeline_mode = #tpu.pipeline_mode<synchronous>, transform_indices = @transform_3, window_bounds = array<i64: 1, 32>}, {pipeline_mode = #tpu.pipeline_mode<synchronous>, transform_indices = @transform_4, window_bounds = array<i64: 32, 64>}, {pipeline_mode = #tpu.pipeline_mode<synchronous>, transform_indices = @transform_5, window_bounds = array<i64: 64, 64>}, {pipeline_mode = #tpu.pipeline_mode<synchronous>, transform_indices = @transform_6, window_bounds = array<i64: 1, 64>}, {pipeline_mode = #tpu.pipeline_mode<synchronous>, transform_indices = @transform_7, window_bounds = array<i64: 8, 64>}, {transform_indices = @transform_8, window_bounds = array<i64: 1, 1>}, {transform_indices = @transform_9, window_bounds = array<i64: 1, 8>}, {transform_indices = @transform_10, window_bounds = array<i64: 8, 64>}]} {
    %c0 = arith.constant 0 : index
    %c0_0 = arith.constant 0 : index
    %0 = vector.load %arg1[%c0, %c0_0] : memref<8x32xf32, #tpu.memory_space<vmem>>, vector<8x32xf32>
    %c0_1 = arith.constant 0 : index
    %c0_2 = arith.constant 0 : index
    %1 = vector.load %arg3[%c0_1, %c0_2] : memref<32x32xf32, #tpu.memory_space<vmem>>, vector<32x32xf32>
    %cst = arith.constant dense<0.000000e+00> : vector<8x32xf32>
    %2 = tpu.matmul %0, %1, %cst {dimension_numbers = #tpu.dot_dimension_numbers<[1], [0], [0], [1], [0, 0, 1, 1], [], []>} : vector<8x32xf32>, vector<32x32xf32>, vector<8x32xf32> -> vector<8x32xf32>
    %c0_3 = arith.constant 0 : index
    %c0_4 = arith.constant 0 : index
    %3 = vector.load %arg4[%c0_3, %c0_4] : memref<1x32xf32, #tpu.memory_space<vmem>>, vector<1x32xf32>
    %4 = vector.broadcast %3 : vector<1x32xf32> to vector<8x32xf32>
    %5 = arith.addf %2, %4 : vector<8x32xf32>
    %cst_5 = arith.constant 0.000000e+00 : f32
    %cst_6 = arith.constant 6.000000e+00 : f32
    %6 = vector.broadcast %cst_5 : f32 to vector<8x32xf32>
    %7 = arith.maximumf %6, %5 : vector<8x32xf32>
    %8 = vector.broadcast %cst_6 : f32 to vector<8x32xf32>
    %9 = arith.minimumf %8, %7 : vector<8x32xf32>
    %c0_7 = arith.constant 0 : index
    %c0_8 = arith.constant 0 : index
    %10 = vector.load %arg5[%c0_7, %c0_8] : memref<32x64xf32, #tpu.memory_space<vmem>>, vector<32x64xf32>
    %cst_9 = arith.constant dense<0.000000e+00> : vector<8x64xf32>
    %11 = tpu.matmul %9, %10, %cst_9 {dimension_numbers = #tpu.dot_dimension_numbers<[1], [0], [0], [1], [0, 0, 1, 1], [], []>} : vector<8x32xf32>, vector<32x64xf32>, vector<8x64xf32> -> vector<8x64xf32>
    %c0_10 = arith.constant 0 : index
    %c0_11 = arith.constant 0 : index
    %12 = vector.load %arg2[%c0_10, %c0_11] : memref<8x64xf32, #tpu.memory_space<vmem>>, vector<8x64xf32>
    %c0_12 = arith.constant 0 : index
    %c0_13 = arith.constant 0 : index
    %13 = vector.load %arg6[%c0_12, %c0_13] : memref<64x64xf32, #tpu.memory_space<vmem>>, vector<64x64xf32>
    %cst_14 = arith.constant dense<0.000000e+00> : vector<8x64xf32>
    %14 = tpu.matmul %12, %13, %cst_14 {dimension_numbers = #tpu.dot_dimension_numbers<[1], [0], [0], [1], [0, 0, 1, 1], [], []>} : vector<8x64xf32>, vector<64x64xf32>, vector<8x64xf32> -> vector<8x64xf32>
    %15 = arith.addf %11, %14 : vector<8x64xf32>
    %c0_15 = arith.constant 0 : index
    %c0_16 = arith.constant 0 : index
    %16 = vector.load %arg7[%c0_15, %c0_16] : memref<1x64xf32, #tpu.memory_space<vmem>>, vector<1x64xf32>
    %17 = vector.broadcast %16 : vector<1x64xf32> to vector<8x64xf32>
    %18 = arith.addf %15, %17 : vector<8x64xf32>
    %19 = math.tanh %18 : vector<8x64xf32>
    %c0_17 = arith.constant 0 : index
    %c0_18 = arith.constant 0 : index
    %20 = vector.load %arg11[%c0_17, %c0_18] : memref<8x64xf32, #tpu.memory_space<vmem>>, vector<8x64xf32>
    tpu.vector_store %arg11[%c0_17, %c0_18], %19 {strides = array<i32>} : memref<8x64xf32, #tpu.memory_space<vmem>>, vector<8x64xf32>,
    %cst_19 = arith.constant 0.000000e+00 : f32
    %cst_20 = arith.constant 6.000000e+00 : f32
    %21 = vector.broadcast %cst_19 : f32 to vector<8x64xf32>
    %22 = arith.maximumf %21, %19 : vector<8x64xf32>
    %23 = vector.broadcast %cst_20 : f32 to vector<8x64xf32>
    %24 = arith.minimumf %23, %22 : vector<8x64xf32>
    %c0_21 = arith.constant 0 : index
    %c0_22 = arith.constant 0 : index
    %25 = vector.load %arg8[%c0_21, %c0_22] : memref<8x64xf32, #tpu.memory_space<vmem>>, vector<8x64xf32>
    %26 = tpu.transpose %24, [1, 0] : vector<8x64xf32> -> vector<64x8xf32>
    %cst_23 = arith.constant dense<0.000000e+00> : vector<8x8xf32>
    %27 = tpu.matmul %25, %26, %cst_23 {dimension_numbers = #tpu.dot_dimension_numbers<[1], [0], [0], [1], [0, 0, 1, 1], [], []>} : vector<8x64xf32>, vector<64x8xf32>, vector<8x8xf32> -> vector<8x8xf32>
    %28 = vector.extract_strided_slice %27 {offsets = [0, 0], sizes = [1, 8], strides = [1, 1]} : vector<8x8xf32> to vector<1x8xf32>
    %c0_24 = arith.constant 0 : index
    %c0_25 = arith.constant 0 : index
    %29 = memref.load %arg9[%c0_24, %c0_25] : memref<1x1xf32, #tpu.memory_space<smem>>
    %30 = vector.broadcast %29 : f32 to vector<1x8xf32>
    %31 = arith.addf %28, %30 : vector<1x8xf32>
    %c0_26 = arith.constant 0 : index
    %c0_27 = arith.constant 0 : index
    %32 = vector.load %arg10[%c0_26, %c0_27] : memref<1x8xf32, #tpu.memory_space<vmem>>, vector<1x8xf32>
    tpu.vector_store %arg10[%c0_26, %c0_27], %31 {strides = array<i32>} : memref<1x8xf32, #tpu.memory_space<vmem>>, vector<1x8xf32>,
    return
  }
  func.func @transform_0(%arg0: i32) -> (i32, i32) {
    %c0_i32 = arith.constant 0 : i32
    %c0_i32_0 = arith.constant 0 : i32
    return %arg0, %c0_i32 : i32, i32
  }
  func.func @transform_1(%arg0: i32) -> (i32, i32) {
    %c0_i32 = arith.constant 0 : i32
    %c0_i32_0 = arith.constant 0 : i32
    return %arg0, %c0_i32 : i32, i32
  }
  func.func @transform_2(%arg0: i32) -> (i32, i32) {
    %c0_i32 = arith.constant 0 : i32
    %c0_i32_0 = arith.constant 0 : i32
    %c0_i32_1 = arith.constant 0 : i32
    return %c0_i32, %c0_i32_0 : i32, i32
  }
  func.func @transform_3(%arg0: i32) -> (i32, i32) {
    %c0_i32 = arith.constant 0 : i32
    %c0_i32_0 = arith.constant 0 : i32
    %c0_i32_1 = arith.constant 0 : i32
    return %c0_i32, %c0_i32_0 : i32, i32
  }
  func.func @transform_4(%arg0: i32) -> (i32, i32) {
    %c0_i32 = arith.constant 0 : i32
    %c0_i32_0 = arith.constant 0 : i32
    %c0_i32_1 = arith.constant 0 : i32
    return %c0_i32, %c0_i32_0 : i32, i32
  }
  func.func @transform_5(%arg0: i32) -> (i32, i32) {
    %c0_i32 = arith.constant 0 : i32
    %c0_i32_0 = arith.constant 0 : i32
    %c0_i32_1 = arith.constant 0 : i32
    return %c0_i32, %c0_i32_0 : i32, i32
  }
  func.func @transform_6(%arg0: i32) -> (i32, i32) {
    %c0_i32 = arith.constant 0 : i32
    %c0_i32_0 = arith.constant 0 : i32
    %c0_i32_1 = arith.constant 0 : i32
    return %c0_i32, %c0_i32_0 : i32, i32
  }
  func.func @transform_7(%arg0: i32) -> (i32, i32) {
    %c0_i32 = arith.constant 0 : i32
    %c0_i32_0 = arith.constant 0 : i32
    %c0_i32_1 = arith.constant 0 : i32
    return %c0_i32, %c0_i32_0 : i32, i32
  }
  func.func @transform_8(%arg0: i32) -> (i32, i32) {
    %c0_i32 = arith.constant 0 : i32
    %c0_i32_0 = arith.constant 0 : i32
    %c0_i32_1 = arith.constant 0 : i32
    return %c0_i32, %c0_i32_0 : i32, i32
  }
  func.func @transform_9(%arg0: i32) -> (i32, i32) {
    %c0_i32 = arith.constant 0 : i32
    %c0_i32_0 = arith.constant 0 : i32
    return %c0_i32, %arg0 : i32, i32
  }
  func.func @transform_10(%arg0: i32) -> (i32, i32) {
    %c0_i32 = arith.constant 0 : i32
    %c0_i32_0 = arith.constant 0 : i32
    return %arg0, %c0_i32 : i32, i32
  }
}

</mosaic_0001>

<bundles_post_ra>
// kernel: tpu_custom_call.1
= control target key start
LH: loop header
LB: loop body
LE: loop exit
PB: predicated region body
PF: predicated region fallthrough
CT: control target
= control target key end

     0   :  { %17 = vsyncpa [#allocation4], 0  ;;  %s663_s0 = inlined_call_operand.hbm [shape: f32[8,32], index: 0, kind: input, shape index: {}]   ;;  %s664_s1 = inlined_call_operand.hbm [shape: f32[8,64], index: 1, kind: input, shape index: {}]   ;;  %s665_s2 = inlined_call_operand.hbm [shape: f32[32,32], index: 2, kind: input, shape index: {}]   ;;  %s666_s3 = inlined_call_operand.hbm [shape: f32[1,32], index: 3, kind: input, shape index: {}]   ;;  %s667_s4 = inlined_call_operand.hbm [shape: f32[32,64], index: 4, kind: input, shape index: {}]   ;;  %s668_s5 = inlined_call_operand.hbm [shape: f32[64,64], index: 5, kind: input, shape index: {}]   ;;  %s669_s6 = inlined_call_operand.hbm [shape: f32[1,64], index: 6, kind: input, shape index: {}]   ;;  %s670_s7 = inlined_call_operand.vmem [shape: f32[8,64], index: 7, kind: input, shape index: {}]   ;;  %s671_s8 = inlined_call_operand.<no memory space> [shape: f32[1,1], index: 8, kind: input, shape index: {}]   ;;  %s672_s9 = inlined_call_operand.hbm [shape: f32[1,8], index: 9, kind: output, shape index: {0}]   ;;  %s673_s10 = inlined_call_operand.hbm [shape: f32[8,64], index: 10, kind: output, shape index: {1}]  }
   0x1   :  { %18 = vsyncpa [#allocation7], 0 }
   0x2   :  { %19 = vsyncpa [#allocation10], 0 }
   0x3   :  { %20 = vsyncpa [#allocation13], 0 }
   0x4   :  { %21 = vsyncpa [#allocation5], 0  ;;  %s39_s15 = sshll.u32 %s664_s1, 4  ;;  %s40_s15 = int_to_ptr.hbm [resolvable:$true] %s39_s15 }
   0x5   :  { %22 = vsyncpa [#allocation17], 0  ;;  %s558_s16 = smov [#allocation6]   ;;  %s63_s20 = sshll.u32 %s666_s3, 4  ;;  %s64_s20 = int_to_ptr.hbm [resolvable:$true] %s63_s20 }
   0x6   :  { %s41_s17 = sshll.u32 %s558_s16, 4  ;;  %s559_s21 = smov [#allocation9]   ;;  %s42_s17 = int_to_ptr.vmem [resolvable:$true] %s41_s17 }
   0x7   :  { %44 = dma.hbm_to_vmem [thread:$0]  %s40_s15, 128, %s42_s17, [#allocation7]  }
   0x8   :  { %s65_s22 = sshll.u32 %s559_s21, 4  ;;  %s86_s25 = sshll.u32 %s668_s5, 4  ;;  %s66_s22 = int_to_ptr.vmem [resolvable:$true] %s65_s22  ;;  %s87_s25 = int_to_ptr.hbm [resolvable:$true] %s86_s25 }
   0x9   :  { %68 = dma.hbm_to_vmem [thread:$0]  %s64_s20, 16, %s66_s22, [#allocation10]  }
   0xa   :  { %s560_s1 = smov [#allocation12]   ;;  %s28_s29 = sshll.u32 %s663_s0, 4  ;;  %s29_s29 = int_to_ptr.hbm [resolvable:$true] %s28_s29 }
   0xb   :  { %s88_s26 = sshll.u32 %s560_s1, 4  ;;  %s561_s30 = smov 128   ;;  %s89_s26 = int_to_ptr.vmem [resolvable:$true] %s88_s26 }
   0xc   :  { %s562_s3 = smov 8   ;;  %s563_s11 = smov [#allocation3]  }
   0xd   :  { %94 = dma.hbm_to_vmem [thread:$0]  %s87_s25, 1024, %s89_s26, [#allocation13], %s561_s30, %s561_s30, %s562_s3  }
   0xe   :  { %s30_s12 = sshll.u32 %s563_s11, 4  ;;  %s49_s15 = sshll.u32 %s665_s2, 4  ;;  %s31_s12 = int_to_ptr.vmem [resolvable:$true] %s30_s12  ;;  %s50_s15 = int_to_ptr.hbm [resolvable:$true] %s49_s15 }
   0xf   :  { %33 = dma.hbm_to_vmem [thread:$0]  %s29_s29, 128, %s31_s12, [#allocation4]  }
  0x10   :  { %s73_s17 = sshll.u32 %s667_s4, 4  ;;  %s564_s18 = smov [#allocation8]   ;;  %s74_s17 = int_to_ptr.hbm [resolvable:$true] %s73_s17 }
  0x11   :  { %s51_s19 = sshll.u32 %s564_s18, 4  ;;  %s565_s0 = smov [#allocation11]   ;;  %s52_s19 = int_to_ptr.vmem [resolvable:$true] %s51_s19 }
  0x12   :  { %57 = dma.hbm_to_vmem [thread:$0]  %s50_s15, 512, %s52_s19, [#allocation7], %s561_s30, %s561_s30, %s562_s3  }
  0x13   :  { %s75_s20 = sshll.u32 %s565_s0, 4  ;;  %s100_s23 = sshll.u32 %s669_s6, 4  ;;  %s76_s20 = int_to_ptr.vmem [resolvable:$true] %s75_s20  ;;  %s101_s23 = int_to_ptr.hbm [resolvable:$true] %s100_s23 }
  0x14   :  { %81 = dma.hbm_to_vmem [thread:$0]  %s74_s17, 512, %s76_s20, [#allocation10], %s561_s30, %s561_s30, %s562_s3  }
  0x15   :  { %s566_s2 = smov [#allocation14]  }
  0x16   :  { %s102_s24 = sshll.u32 %s566_s2, 4  ;;  %s103_s24 = int_to_ptr.vmem [resolvable:$true] %s102_s24 }
  0x17   :  { %105 = dma.hbm_to_vmem [thread:$0]  %s101_s23, 16, %s103_s24, [#allocation13]  }
  0x18   :  { %546 = dma.done.wait [#allocation4], 128  }
  0x19   :  { %547 = vsyncadd [#allocation4], 4294967168 }
  0x1a   :  { %548 = dma.done.wait [#allocation7], 640  }
  0x1b   :  { %549 = vsyncadd [#allocation7], 4294966656 }
  0x1c   :  { %550 = dma.done.wait [#allocation10], 528  }
  0x1d   :  { %551 = vsyncadd [#allocation10], 4294966768 }
  0x1e   :  { %552 = dma.done.wait [#allocation13], 1040  }
  0x1f   :  { %553 = vsyncadd [#allocation13], 4294966256  ;;  %v142_v0 = vld [vmem:[#allocation8 + $0x18] sm:$0xff]  ;;  %v141_v1 = vld [vmem:[#allocation8 + $0x10] sm:$0xff]  ;;  %vm147_vm0 = vcmask 261120   ;;  %vm186_vm1 = vcmask 523264   ;;  %v270_v32 = vstv %s671_s8 }
  0x20   :  { %163 = vmatpush.msra.mxu0 %v142_v0  ;;  %v185_v2 = vld [vmem:[#allocation12 + $0x38] sm:$0xff]  ;;  %v140_v3 = vld [vmem:[#allocation8 + $0x8] sm:$0xff]  ;;  %v138_v5 = vld [vmem:[#allocation3] sm:$0xff]  ;;  %s567_s25 = smov [#allocation16]   ;;  %s292_s28 = sshll.u32 %s673_s10, 4  ;;  %vm272_vm2 = vcmask 57344   ;;  %s293_s28 = int_to_ptr.hbm [resolvable:$true] %s292_s28 }
  0x21   :  { %198 = vmatpush.msra.mxu1 %v185_v2  ;;  %v139_v4 = vld [vmem:[#allocation8] sm:$0xff]  ;;  %v184_v6 = vld [vmem:[#allocation12 + $0x30] sm:$0xff]  ;;  %v183_v8 = vld [vmem:[#allocation12 + $0x28] sm:$0xff]  ;;  %s290_s1 = sshll.u32 %s567_s25, 4  ;;  %s568_s3 = smov [#allocation15]   ;;  %s291_s1 = int_to_ptr.vmem [resolvable:$true] %s290_s1 }
  0x22   :  { %164 = vmatpush.msra.mxu0 %v141_v1  ;;  %v176_v7 = vld [vmem:[#allocation11 + $0x18] sm:$0xff]  ;;  %v175_v9 = vld [vmem:[#allocation11 + $0x10] sm:$0xff]  ;;  %v182_v10 = vld [vmem:[#allocation12 + $0x20] sm:$0xff]  ;;  %s279_s11 = sshll.u32 %s568_s3, 4  ;;  %s280_s11 = int_to_ptr.vmem [resolvable:$true] %s279_s11 }
  0x23   :  { %199 = vmatpush.msra.mxu1 %v184_v6  ;;  %225 = vmatpush.msra.mxu2 %v176_v7  ;;  %v174_v11 = vld [vmem:[#allocation11 + $0x8] sm:$0xff]  ;;  %v181_v12 = vld [vmem:[#allocation12 + $0x18] sm:$0xff]  ;;  %v173_v13 = vld [vmem:[#allocation11] sm:$0xff] }
  0x24   :  { %165 = vmatpush.msra.mxu0 %v140_v3  ;;  %v180_v14 = vld [vmem:[#allocation12 + $0x10] sm:$0xff]  ;;  %v179_v15 = vld [vmem:[#allocation12 + $0x8] sm:$0xff]  ;;  %v178_v16 = vld [vmem:[#allocation12] sm:$0xff] }
  0x25   :  { %200 = vmatpush.msra.mxu1 %v183_v8  ;;  %226 = vmatpush.msra.mxu2 %v175_v9  ;;  %v177_v17 = vld [vmem:[#allocation6] sm:$0xff]  ;;  %v326_v18 = vld [vmem:[#allocation9] ss:$0 sm:$0xff]  ;;  %v327_v24 = vld [vmem:[#allocation14] ss:$0 sm:$0xff] }
  0x26   :  { %166 = vmatpush.msra.mxu0 %v139_v4  ;;  %v242_v31 = vld [vmem:[%s670_s7] sm:$0xff]  ;;  %s281_s7 = sshll.u32 %s672_s9, 4  ;;  %s282_s7 = int_to_ptr.hbm [resolvable:$true] %s281_s7 }
  0x27   :  { %310 = vmatmul.msk.f32.vlgmr.msra.gmra.mxu0 %vm147_vm0, %v138_v5  ;;  %201 = vmatpush.msra.mxu1 %v182_v10 }
  0x28   :  { %227 = vmatpush.msra.mxu2 %v174_v11 }
  0x29   :  { %202 = vmatpush.msra.mxu1 %v181_v12 }
  0x2a   :  { %228 = vmatpush.msra.mxu2 %v173_v13 }
  0x2b   :  { %203 = vmatpush.msra.mxu1 %v180_v14 }
  0x2d   :  { %204 = vmatpush.msra.mxu1 %v179_v15 }
  0x2f   :  { %205 = vmatpush.msra.mxu1 %v178_v16 }
  0x30   :  { %311 = vmatmul.msk.f32.vlgmr.msra.gmra.mxu1 %vm186_vm1, %v177_v17 }
  0xa4   :  { %v168_v19 = vpop.f32.mrf.mxu0 }
  0xa5   :  { %v169_v20 = vadd.f32 %v326_v18, %v168_v19 }
  0xa7   :  { %v171_v21 = vmax.f32 %v169_v20, 0.0 }
  0xa9   :  { %v172_v22 = vmin.f32 %v171_v21, 6.0 }
  0xab   :  { %312 = vmatmul.msk.f32.vlgmr.msra.gmra.mxu2 %vm147_vm0, %v172_v22 }
  0xad   :  { %v207_v23 = vpop.f32.mrf.mxu1 }
 0x12e   :  { %v230_v25 = vpop.f32.mrf.mxu2 }
 0x12f   :  { %v231_v26 = vadd.f32 %v230_v25, %v207_v23 }
 0x131   :  { %v237_v27 = vadd.f32 %v327_v24, %v231_v26 }
 0x133   :  { %328 = vtanh.f32 %v237_v27 }
 0x139   :  { %v329_v28 = vpop.eup %328 }
 0x13a   :  { %239 = vst.msk [vmem:[#allocation16] sm:$0xff] %vm186_vm1, %v329_v28  ;;  %v240_v29 = vmax.f32 %v329_v28, 0.0 }
 0x13b   :  { %295 = dma.vmem_to_hbm [thread:$0]  %s291_s1, 128, %s293_s28, [#allocation17]  }
 0x13c   :  { %v241_v30 = vmin.f32 %v240_v29, 6.0 }
 0x13e   :  { %313 = vmatpush.xpose.msk.msra.mxu3 %vm186_vm1, %v241_v30 }
 0x141   :  { %314 = vmatmul.msk.f32.vlgmr.msra.gmra.mxu3 %vm186_vm1, %v242_v31 }
 0x1c4   :  { %v266_v33 = vpop.f32.mrf.mxu3 }
 0x1c5   :  { %v271_v34 = vadd.f32 %v270_v32, %v266_v33 }
 0x1c7   :  { %273 = vst.msk [vmem:[#allocation15] sm:$0x1] %vm272_vm2, %v271_v34 }
 0x1c8   :  { %284 = dma.vmem_to_hbm [thread:$0]  %s280_s11, 16, %s282_s7, [#allocation5]  }
 0x1c9   :  { %554 = dma.done.wait [#allocation5], 16  }
 0x1ca   :  { %555 = vsyncadd [#allocation5], 4294967280 }
 0x1cb   :  { %556 = dma.done.wait [#allocation17], 128  }
 0x1cc   :  { %557 = vsyncadd [#allocation17], 4294967168 }
 0x1cd   :  { %304 = vsyncpa [#allocation4], 1 }
 0x1ce   :  { %305 = vsyncpa [#allocation7], 1 }
 0x1cf   :  { %306 = vsyncpa [#allocation10], 1 }
 0x1d0   :  { %307 = vsyncpa [#allocation13], 1 }
 0x1d1   :  { %308 = vsyncpa [#allocation5], 1 }
 0x1d2   :  { %309 = vsyncpa [#allocation17], 1 }

</bundles_post_ra>
